<compile_context>
chip_gen: v5e
topology: v5e:2x2
jax: 0.10.0
libtpu: 0.0.40
codegen_flags: <defaults>
</compile_context>

<pallas_src>
import functools
import math

import jax
import jax.numpy as jnp
from jax import lax
from jax.experimental import pallas as pl
from jax.experimental.pallas import tpu as pltpu


_LOG10K = math.log(10000.0)
_VMEM_LIMIT_BYTES = 32 * 1024 * 1024  # <= physical VMEM on v5e/v6e (128 MiB) and v7x (64 MiB)

# Tri-state cache: None = untried, True = in-kernel sin lowering works, False = use the
# table-streaming fallback kernel.
_INKERNEL_PE_OK = None


def build_pe_table(d_model: int, max_len: int = 5000) -> jnp.ndarray:
    """Replicates the buffer computed in PositionalEncoding.__init__ (shape (max_len, d_model))."""
    position = jnp.arange(0, max_len, dtype=jnp.float32)[:, None]               # (max_len, 1)
    div_term = jnp.exp(
        jnp.arange(0, d_model, 2, dtype=jnp.float32) * (-_LOG10K / d_model)
    )                                                                            # (ceil(d/2),)
    angles = position * div_term                                                 # (max_len, ceil(d/2))
    pe = jnp.zeros((max_len, d_model), dtype=jnp.float32)
    pe = pe.at[:, 0::2].set(jnp.sin(angles))
    pe = pe.at[:, 1::2].set(jnp.cos(angles[:, : d_model // 2]))                  # odd d_model safe
    return pe


# ---------------------------------------------------------------------------
# Kernels
# ---------------------------------------------------------------------------

def _pe_inkernel_tiled(x_ref, o_ref, pe_vmem, *, ts, d_model):
    """x_ref/o_ref: (ts, D) (batch squeezed); pe_vmem: persistent (ts, D) scratch.

    The PE tile is generated on-chip once per seq tile (at b == 0) and reused for every
    batch element of that tile -> zero PE HBM traffic.  Single-sin formulation:
        pe[p, d] = sin(p * w(d) + (pi/2) * (d % 2)),   w(d) = 10000^(-2*floor(d/2) / D)
    which matches the sin/cos interleaving of the reference table.
    """
    b = pl.program_id(1)

    @pl.when(b == 0)
    def _():
        s = pl.program_id(0)
        # (ts, 1) positions for this seq tile; (1, D) per-dim frequency / phase rows.
        pos = (s * ts + lax.broadcasted_iota(jnp.int32, (ts, 1), 0)).astype(jnp.float32)
        dim = lax.broadcasted_iota(jnp.int32, (1, d_model), 1)
        inv_freq = jnp.exp(((dim // 2) * 2).astype(jnp.float32) * (-_LOG10K / d_model))
        phase = (dim % 2).astype(jnp.float32) * (math.pi / 2.0)   # +pi/2 on odd dims -> cos
        pe_vmem[...] = jnp.sin(pos * inv_freq + phase).astype(pe_vmem.dtype)

    o_ref[...] = x_ref[...] + pe_vmem[...]


def _pe_table_tiled(x_ref, pe_ref, o_ref):
    """Fallback: PE tile streamed from HBM via BlockSpec (block index constant over the
    inner batch axis, so the PE DMA is issued once per seq tile)."""
    o_ref[...] = x_ref[...] + pe_ref[...]


# ---------------------------------------------------------------------------
# Tiling
# ---------------------------------------------------------------------------

def _choose_seq_tile(S, D, itemsize, budget_bytes, total_bytes):
    """Sequence-tile rows: clamped to the byte budget, aligned to the packed-sublane
    multiple of the dtype, cdiv grid (last tile may be partial; Pallas masks it)."""
    sub = max(8, 32 // max(1, itemsize))          # 8 f32, 16 bf16/f16, 32 int8/fp8
    row_bytes = max(1, D * itemsize)
    max_rows = max(sub, budget_bytes // row_bytes)
    if S <= max_rows:
        ts = S                                     # whole sequence per block (full-dim escape)
    else:
        ts = (max_rows // sub) * sub               # clamp to budget, sublane-aligned
    # Give the megacore-sharded ("parallel", outer) seq axis >= 2 steps for non-tiny slabs
    # so both v7x TensorCores stream data; one extra grid step is harmless on v5e/v6e.
    if ts == S and S >= 2 * sub and total_bytes >= (512 << 10):
        half = (S + 1) // 2
        ts = ((half + sub - 1) // sub) * sub
    num_tiles = (S + ts - 1) // ts
    return ts, num_tiles


# ---------------------------------------------------------------------------
# pallas_call wrappers
# ---------------------------------------------------------------------------

def _call_inkernel(x3, ts, num_tiles, donate_x):
    B, S, D = x3.shape
    itemsize = jnp.dtype(x3.dtype).itemsize
    block = pl.BlockSpec((pl.Squeezed(), ts, D), lambda s, b: (b, s, 0))
    return pl.pallas_call(
        functools.partial(_pe_inkernel_tiled, ts=ts, d_model=D),
        out_shape=jax.ShapeDtypeStruct((B, S, D), x3.dtype),
        grid=(num_tiles, B),                        # seq outer (parallel), batch inner (arbitrary)
        in_specs=[block],
        out_specs=block,
        scratch_shapes=[pltpu.VMEM((ts, D), x3.dtype)],   # persistent PE tile
        compiler_params=pltpu.CompilerParams(
            dimension_semantics=("parallel", "arbitrary"),
            vmem_limit_bytes=_VMEM_LIMIT_BYTES),
        cost_estimate=pl.CostEstimate(
            flops=int(B * S * D),
            transcendentals=int(S * D),             # PE generated once per seq tile
            bytes_accessed=int(2 * B * S * D * itemsize)),
        input_output_aliases=({0: 0} if donate_x else {}),
    )(x3)


def _call_table(x3, pe_slice, ts, num_tiles, donate_x):
    B, S, D = x3.shape
    itemsize = jnp.dtype(x3.dtype).itemsize
    block = pl.BlockSpec((pl.Squeezed(), ts, D), lambda s, b: (b, s, 0))
    return pl.pallas_call(
        _pe_table_tiled,
        out_shape=jax.ShapeDtypeStruct((B, S, D), x3.dtype),
        grid=(num_tiles, B),
        in_specs=[block, pl.BlockSpec((ts, D), lambda s, b: (s, 0))],
        out_specs=block,
        compiler_params=pltpu.CompilerParams(
            dimension_semantics=("parallel", "arbitrary"),
            vmem_limit_bytes=_VMEM_LIMIT_BYTES),
        cost_estimate=pl.CostEstimate(
            flops=int(B * S * D),
            transcendentals=0,
            bytes_accessed=int((2 * B + 1) * S * D * itemsize)),
        input_output_aliases=({0: 0} if donate_x else {}),
    )(x3, pe_slice)


# ---------------------------------------------------------------------------
# Public wrapper
# ---------------------------------------------------------------------------

def positional_encoding(
    x: jnp.ndarray,
    pe_table: jnp.ndarray | None = None,
    *,
    max_len: int = 5000,
    seq_tile_budget_bytes: int = 2 << 20,   # ~2 MiB x-tile: at the measured HBM-roofline plateau
    min_pallas_bytes: int = 64 << 10,       # below this, plain XLA add (fuses with neighbours)
    donate_x: bool = False,                 # set only when the caller does not reuse x
) -> jnp.ndarray:
    """out = x + pe[:seq] broadcast over leading dims (pos=None path; dropout p=0 -> identity)."""
    global _INKERNEL_PE_OK

    if x.ndim < 2:
        raise ValueError("x must have at least 2 dims (..., seq, d_model)")
    *lead, S, D = x.shape
    B = int(math.prod(lead))
    limit = pe_table.shape[0] if pe_table is not None else max_len
    if S > limit:
        raise ValueError(f"seq len {S} exceeds max_len {limit}")

    itemsize = jnp.dtype(x.dtype).itemsize
    total_bytes = B * S * D * itemsize

    def _pe_slice():
        tab = pe_table if pe_table is not None else build_pe_table(D, S)
        return tab[:S, :].astype(x.dtype)

    # Truly tiny inputs: the pallas_call fixed overhead and fusion barrier dominate -> plain add.
    if total_bytes < min_pallas_bytes:
        return x + _pe_slice()

    x3 = x.reshape(B, S, D)
    ts, num_tiles = _choose_seq_tile(S, D, itemsize, seq_tile_budget_bytes, total_bytes)

    out3 = None
    if _INKERNEL_PE_OK is not False:
        try:
            out3 = _call_inkernel(x3, ts, num_tiles, donate_x)
            if _INKERNEL_PE_OK is None:
                jax.block_until_ready(out3)   # surface lowering errors eagerly on first use
                _INKERNEL_PE_OK = True
        except Exception:
            if _INKERNEL_PE_OK:               # primary path previously worked -> real error
                raise
            _INKERNEL_PE_OK = False           # e.g. no in-kernel sin lowering -> table fallback
            out3 = None
    if out3 is None:
        out3 = _call_table(x3, _pe_slice(), ts, num_tiles, donate_x)
    return out3.reshape(x.shape)


# ---------------------------------------------------------------------------
# Self-test
# ---------------------------------------------------------------------------

if __name__ == "__main__":
    root = jax.random.PRNGKey(0)
    k1, k2, k3 = jax.random.split(root, 3)

    # --- Small shape consistent with the module: batch=2, seq=8, d_model=32. ---
    B, S, D = 2, 8, 32
    MAX_LEN = 64  # small max_len for the synthetic test (module default is 5000)
    x = jax.random.normal(k1, (B, S, D), dtype=jnp.float32)
    pe_table = build_pe_table(D, MAX_LEN)
    ref = x + pe_table[None, :S, :]

    # Force the Pallas path even at this tiny size so the kernel itself is exercised.
    out = jax.block_until_ready(positional_encoding(x, pe_table, min_pallas_bytes=0))
    assert out.shape == (B, S, D)
    assert jnp.allclose(out, ref, atol=1e-4), "f32 small-shape kernel mismatch vs reference"

    # Default behaviour at tiny size: wrapper bypasses Pallas with a fused XLA add.
    out_tiny = jax.block_until_ready(positional_encoding(x, pe_table))
    assert jnp.allclose(out_tiny, ref, atol=1e-5), "tiny-bypass mismatch vs reference"

    # --- bf16 activations (PE generated in f32, cast to the activation dtype). ---
    xb = x.astype(jnp.bfloat16)
    refb = xb + pe_table[:S, :].astype(jnp.bfloat16)[None]
    outb = jax.block_until_ready(positional_encoding(xb, pe_table, min_pallas_bytes=0))
    assert outb.dtype == jnp.bfloat16
    # in-kernel PE may differ from the table by 1 bf16 ulp -> allow a couple of ulps of slack.
    assert jnp.allclose(outb.astype(jnp.float32), refb.astype(jnp.float32), atol=6e-2), \
        "bf16 mismatch vs reference"

    # --- Larger shape: seq-tiled path (2 MiB tiles, grid=(2, B), in-kernel PE). ---
    B2, S2, D2 = 2, 2048, 512
    x2 = jax.random.normal(k2, (B2, S2, D2), dtype=jnp.float32)
    pe_table2 = build_pe_table(D2, 4096)
    out2 = jax.block_until_ready(positional_encoding(x2, pe_table2))
    ref2 = x2 + pe_table2[None, :S2, :]
    # tolerance covers sin range-reduction / sin(x+pi/2)-vs-cos differences at angles ~2e3.
    assert jnp.allclose(out2, ref2, atol=5e-3), "f32 tiled-path mismatch vs reference"

    # --- Sequence length that does not divide the tile: exercises the cdiv / partial-tile path. ---
    S3 = 1576
    x3 = jax.random.normal(k3, (1, S3, D2), dtype=jnp.float32)
    out3 = jax.block_until_ready(positional_encoding(x3, pe_table2))
    ref3 = x3 + pe_table2[None, :S3, :]
    assert jnp.allclose(out3, ref3, atol=5e-3), "partial-tile mismatch vs reference"

    print("KERNEL_OK")
</pallas_src>

<mosaic_0001>
module attributes {stable_mosaic.version = 11 : i64} {
  func.func @_pe_table_tiled(%arg0: i32, %arg1: i32, %arg2: memref<1x8x32xf32, #tpu.memory_space<vmem>>, %arg3: memref<8x32xf32, #tpu.memory_space<vmem>>, %arg4: memref<1x8x32xf32, #tpu.memory_space<vmem>>) attributes {dimension_semantics = [#tpu.dimension_semantics<parallel>, #tpu.dimension_semantics<arbitrary>], iteration_bounds = array<i64: 1, 2>, scalar_prefetch = 0 : i64, scratch_operands = 0 : i64, tpu.core_type = #tpu.core_type<tc>, window_params = [{transform_indices = @transform_0, window_bounds = array<i64: 1, 8, 32>}, {transform_indices = @transform_1, window_bounds = array<i64: 8, 32>}, {transform_indices = @transform_2, window_bounds = array<i64: 1, 8, 32>}]} {
    %c0 = arith.constant 0 : index
    %c0_0 = arith.constant 0 : index
    %c0_1 = arith.constant 0 : index
    %0 = vector.load %arg2[%c0, %c0_0, %c0_1] : memref<1x8x32xf32, #tpu.memory_space<vmem>>, vector<1x8x32xf32>
    %1 = vector.shape_cast %0 : vector<1x8x32xf32> to vector<8x32xf32>
    %c0_2 = arith.constant 0 : index
    %c0_3 = arith.constant 0 : index
    %2 = vector.load %arg3[%c0_2, %c0_3] : memref<8x32xf32, #tpu.memory_space<vmem>>, vector<8x32xf32>
    %3 = arith.addf %1, %2 : vector<8x32xf32>
    %c0_4 = arith.constant 0 : index
    %c0_5 = arith.constant 0 : index
    %c0_6 = arith.constant 0 : index
    %4 = vector.load %arg4[%c0_4, %c0_5, %c0_6] : memref<1x8x32xf32, #tpu.memory_space<vmem>>, vector<1x8x32xf32>
    %5 = vector.shape_cast %4 : vector<1x8x32xf32> to vector<8x32xf32>
    %6 = vector.shape_cast %3 : vector<8x32xf32> to vector<1x8x32xf32>
    tpu.vector_store %arg4[%c0_4, %c0_5, %c0_6], %6 {strides = array<i32>} : memref<1x8x32xf32, #tpu.memory_space<vmem>>, vector<1x8x32xf32>,
    return
  }
  func.func @transform_0(%arg0: i32, %arg1: i32) -> (i32, i32, i32) {
    %c0_i32 = arith.constant 0 : i32
    %c0_i32_0 = arith.constant 0 : i32
    return %arg1, %arg0, %c0_i32 : i32, i32, i32
  }
  func.func @transform_1(%arg0: i32, %arg1: i32) -> (i32, i32) {
    %c0_i32 = arith.constant 0 : i32
    %c0_i32_0 = arith.constant 0 : i32
    return %arg0, %c0_i32 : i32, i32
  }
  func.func @transform_2(%arg0: i32, %arg1: i32) -> (i32, i32, i32) {
    %c0_i32 = arith.constant 0 : i32
    %c0_i32_0 = arith.constant 0 : i32
    return %arg1, %arg0, %c0_i32 : i32, i32, i32
  }
}

</mosaic_0001>

<bundles_post_ra>
// kernel: tpu_custom_call.1
= control target key start
LH: loop header
LB: loop body
LE: loop exit
PB: predicated region body
PF: predicated region fallthrough
CT: control target
= control target key end

     0   :  { %7 = vsyncpa [#allocation3], 0  ;;  %s715_s0 = inlined_call_operand.hbm [shape: f32[2,8,32], index: 0, kind: input, shape index: {}]   ;;  %s716_s1 = inlined_call_operand.hbm [shape: f32[8,32], index: 1, kind: input, shape index: {}]   ;;  %s717_s2 = inlined_call_operand.hbm [shape: f32[2,8,32], index: 2, kind: output, shape index: {}]  }
   0x1   :  { %9 = vsyncpa [#allocation3 + $0x1], 0 }
   0x2   :  { %10 = vsyncpa [#allocation6], 0 }
   0x3   :  { %11 = vsyncpa [#allocation4], 0 }
   0x4   :  { %13 = vsyncpa [#allocation4 + $0x1], 0  ;;  %s566_s9 = smov 0   ;;  %s568_s10 = smov 0  }
   0x5   :  { %s570_s11 = smov 0   ;;  %s572_s12 = smov 0  }
   0x6   :  { %s574_s13 = smov 0   ;;  %s576_s14 = smov 0  }
   0x7 LB: > { %s314_s15 = sadd.s32 4294967295, %s548_s14   ;;  %s315_s16 = sadd.s32 4294967294, %s548_s14   ;;  %s548_s14 = sphi %s576_s14, %s19_s14   ;;  %s544_s13 = sphi %s574_s13, %s729_s13   ;;  %s540_s12 = sphi %s572_s12, %s728_s12   ;;  %s536_s11 = sphi %s570_s11, %s727_s11   ;;  %s532_s10 = sphi %s568_s10, %s726_s10   ;;  %s528_s9 = sphi %s566_s9, %s725_s9  }
   0x8   : > { %p53_p0 = scmp.ne.s32.totalorder %s532_s10, %s528_s9  ;;  %p600_p1 = scmp.eq.s32.totalorder %s314_s15, 0 }
   0x9   : > { %p604_p2 = scmp.eq.s32.totalorder %s314_s15, 1  ;;  %p111_p3 = scmp.eq.s32.totalorder %s315_s16, 1 }
   0xa   : > { %p610_p4 = por %p600_p1, %p53_p0  ;;  %p316_p5 = scmp.ge.s32.totalorder %s548_s14, 1 }
   0xb   : > { %p615_p6 = por %p111_p3, %p53_p0  ;;  %p118_p7 = scmp.lt.s32.totalorder %s548_s14, 3 }
   0xc   : > { %s132_s23 = sshll.u32 %s716_s1, 4  ;;  %p318_p9 = scmp.ge.s32.totalorder %s548_s14, 2  ;;  %s133_s23 = int_to_ptr.hbm [resolvable:$true] %s132_s23 }
   0xd   : > { %p623_p8 = pnand %p316_p5, %p118_p7  ;;  %s550_s25 = smov [#allocation5]  }
   0xe   : > { %s134_s26 = sshll.u32 %s550_s25, 4  ;;  %s28_s27 = sadd.s32 1, %s544_s13  ;;  %s135_s26 = int_to_ptr.vmem [resolvable:$true] %s134_s26 }
   0xf   : > { %p337_p10 = pneg %p623_p8  ;;  %p29_p12 = scmp.ge.s32.totalorder %s28_s27, 2 }
  0x10   : > { %s40_s28 = sadd.s32 1, %s536_s11  ;;  %p47_p13 = scmp.ne.s32.totalorder %s536_s11, %s532_s10 }
  0x11   : > { %p338_p11 = pnand %p337_p10, %p600_p1  ;;  %p48_p0 = scmp.eq.s32.totalorder %s548_s14, 0 }
  0x12   : > { %s731_s27 = smov (%p29_p12, %s28_s27), 0  ;;  %p645_p5 = por %p604_p2, %p47_p13 }
  0x13   : > { %340 = dma.hbm_to_vmem [thread:$0]  (!%p338_p11), %s133_s23, 128, %s135_s26, [#allocation6]  }
  0x14   : > { %p639_p3 = por %p48_p0, %p47_p13  ;;  %s35_s3 = ssub.s32 %s544_s13, %s731_s27 }
  0x15   : > { %p350_p7 = scmp.lt.s32.totalorder %s548_s14, 2  ;;  %p38_p10 = scmp.eq.s32.totalorder %s35_s3, 0 }
  0x16   : > { %s145_s4 = sand.u32 1, %s536_s11   ;;  %s320_s7 = sshll.u32 %s544_s13, 3 }
  0x17   : > { %s319_s5 = sshll.u32 %s145_s4, 3  ;;  %s154_s16 = scalar_lea.hbm %s715_s0, %s320_s7 }
  0x18   : > { %s654_s6 = scalar_select %p38_p10, %s536_s11, %s40_s28  }
  0x19   : > { %s149_s21 = scalar_lea.vmem [#allocation2], %s319_s5  ;;  %s156_s18 = sshll.u32 %s154_s16, 4  ;;  %s157_s18 = int_to_ptr.hbm [resolvable:$true] %s156_s18 }
  0x1a   : > { %s158_s22 = sshll.u32 %s149_s21, 4  ;;  %p342_p2 = pnand %p350_p7, %p639_p3  ;;  %s159_s22 = int_to_ptr.vmem [resolvable:$true] %s158_s22 }
  0x1b   : > { %s146_s23 = scalar_lea.sflag [#allocation3], %s145_s4  ;;  %167 = sbr.rel (%p623_p8) target bundleno = 50 (0x32), region = 28 }
  0x1c   : > { %344 = dma.hbm_to_vmem [thread:$0]  (!%p342_p2), %s157_s18, 128, %s159_s22, %s146_s23  }
  0x1d   : > { %s665_s25 = sand.u32 (!%p623_p8), 1, %s532_s10  }
  0x1e   : > { %s322_s26 = sshll.u32 (!%p623_p8), %s665_s25, 3  ;;  %s170_s28 = scalar_lea.sflag (!%p623_p8), [#allocation3], %s665_s25 }
  0x1f   : > { %s173_s3 = scalar_lea.vmem (!%p623_p8), [#allocation2], %s322_s26 }
  0x20   : > { %515 = dma.done.wait (%p610_p4), %s170_s28, 128  }
  0x21   : > { %517 = vsyncadd (%p610_p4), %s170_s28, 4294967168 }
  0x22   : > { %519 = dma.done.wait (%p600_p1), [#allocation6], 128  }
  0x23   : > { %521 = vsyncadd (%p600_p1), [#allocation6], 4294967168  ;;  %s326_s24 = sshll.u32 %s540_s12, 3  ;;  %s199_s7 = scalar_lea.vmem [#allocation7], %s322_s26  ;;  %v200_v0 = vld [vmem:[%s173_s3] sm:$0xff]  ;;  %v201_v1 = vld [vmem:[#allocation5] sm:$0xff] }
  0x24   : > { %s217_s5 = scalar_lea.hbm %s717_s2, %s326_s24  ;;  %s219_s8 = sshll.u32 %s199_s7, 4  ;;  %vm203_vm0 = vcmask 261120   ;;  %v202_v2 = vadd.f32 %v201_v1, %v200_v0  ;;  %s220_s8 = int_to_ptr.vmem [resolvable:$true] %s219_s8 }
  0x25   : > { %s221_s15 = sshll.u32 %s217_s5, 4  ;;  %s206_s17 = scalar_lea.sflag [#allocation4], %s665_s25  ;;  %s222_s15 = int_to_ptr.hbm [resolvable:$true] %s221_s15 }
  0x26   : > { %204 = vst.msk [vmem:[%s199_s7] sm:$0xff] %vm203_vm0, %v202_v2  ;;  %s476_s19 = sshra.s32 %s222_s15, 4  ;;  %s482_s22 = scalar_lea.hbm %s717_s2, 16  ;;  %s477_s19 = int_to_ptr.hbm [resolvable:$true] %s476_s19 }
  0x27   : > { %s478_s16 = scalar_lea.hbm %s477_s19, 8  ;;  %p483_p11 = scmp.lt.s32.totalorder %s477_s19, %s717_s2 }
  0x28   : > { %p479_p1 = scmp.ne.s32.totalorder %s477_s19, %s478_s16  ;;  %p484_p12 = scmp.lt.s32.totalorder %s482_s22, %s478_s16 }
  0x2a   : > { %p480_p4 = pnand %p479_p1, %p645_p5  ;;  %p485_p13 = por %p484_p12, %p483_p11 }
  0x2c   : > { %p481_p8 = pneg %p480_p4 }
  0x2e   : > { %p486_p0 = pnand %p485_p13, %p481_p8 }
  0x30   : > { %489 = shalt.err (!%p486_p0)
}
  0x31   : > { %335 = dma.vmem_to_hbm [thread:$0]  (%p645_p5), %s220_s8, 128, %s222_s15, %s206_s17  }
  0x32 PF: > { %s233_s25 = sand.u32 1, %s528_s9   ;;  %p346_p3 = pnand %p318_p9, %p615_p6 }
  0x33   : > { %s234_s26 = scalar_lea.sflag [#allocation4], %s233_s25 }
  0x34   : > { %p347_p7 = pneg %p346_p3 }
  0x36   : > { %523 = dma.done.wait (%p347_p7), %s234_s26, 128  }
  0x37   : > { %525 = vsyncadd (%p347_p7), %s234_s26, 4294967168  ;;  %s19_s14 = sadd.s32 1, %s548_s14   ;;  %s725_s9 = smov %s532_s10 }
  0x38   : > { %p16_p10 = scmp.ge.s32.totalorder %s19_s14, 4   ;;  %s726_s10 = smov %s536_s11 }
  0x39   : > { %s727_s11 = smov %s654_s6  ;;  %s728_s12 = smov %s544_s13 }
  0x3a   : > { %s729_s13 = smov %s731_s27  ;;  %18 = sbr.rel (!%p16_p10) target bundleno = 7 (0x7), region = 78 }
  0x3f   :  { %240 = vsyncpa [#allocation3], 1 }
  0x40   :  { %242 = vsyncpa [#allocation3 + $0x1], 1 }
  0x41   :  { %243 = vsyncpa [#allocation6], 1 }
  0x42   :  { %244 = vsyncpa [#allocation4], 1 }
  0x43   :  { %246 = vsyncpa [#allocation4 + $0x1], 1 }

</bundles_post_ra>
